<compile_context>
chip_gen: v5e
topology: v5e:2x2
jax: 0.10.0
libtpu: 0.0.40
codegen_flags: <defaults>
</compile_context>

<pallas_src>
import functools

import jax
import jax.numpy as jnp
from jax.experimental import pallas as pl
from jax.experimental.pallas import tpu as pltpu


def _depthconv1d_kernel(alphas_ref,          # SMEM (2,): [prelu1_alpha, prelu2_alpha]
                        x_ref,               # (1, C_in, T)
                        w1_ref, b1_ref,      # (H, C_in) [mm dtype], (H, 1)
                        g1_ref, be1_ref,     # (H, 1), (H, 1)
                        wd_ref, bd_ref,      # (H, K), (H, 1)
                        g2_ref, be2_ref,     # (H, 1), (H, 1)
                        wrs_ref, brs_ref,    # (2*C_in, H) [mm dtype], (2*C_in, 1)
                        res_ref, skip_ref,   # (1, C_in, T_out) each
                        hp_ref,              # VMEM scratch (H, T + 2*pad)
                        *, k, dil, pad, t_in, t_out, c_in, eps):
    x = x_ref[0]                                   # (C_in, T) f32

    # ---- 1x1 pointwise conv (MXU): (H, C_in) @ (C_in, T) + bias ------------
    w1 = w1_ref[...]
    h = jnp.dot(w1, x.astype(w1.dtype), preferred_element_type=jnp.float32)
    h = h + b1_ref[...]

    # ---- PReLU #1 (single shared alpha) -------------------------------------
    a1 = alphas_ref[0]
    h = jnp.where(h >= 0.0, h, a1 * h)

    # ---- GroupNorm(1, H), eps=1e-8 — single pass, folded affine -------------
    n1 = h.size
    s1 = jnp.sum(h)
    q1 = jnp.sum(h * h)
    mean1 = s1 / n1
    var1 = jnp.maximum(q1 / n1 - mean1 * mean1, 0.0)
    inv1 = jax.lax.rsqrt(var1 + eps)               # EUP slot
    scale1 = g1_ref[...] * inv1                    # (H, 1)
    shift1 = be1_ref[...] - mean1 * scale1         # (H, 1)
    h = h * scale1 + shift1

    # ---- depthwise (groups == hidden) dilated conv1d, zero pad both sides ---
    # Only the two pad strips need zeroing; the interior is overwritten here
    # every step (no full-buffer zero store).
    if pad > 0:
        hp_ref[:, :pad] = jnp.zeros((hp_ref.shape[0], pad), jnp.float32)
        hp_ref[:, pad + t_in:] = jnp.zeros((hp_ref.shape[0], pad), jnp.float32)
    hp_ref[:, pad:pad + t_in] = h
    hp = hp_ref[...]
    wd = wd_ref[...]
    acc = jnp.zeros((hp.shape[0], t_out), dtype=jnp.float32)
    for j in range(k):                              # static unroll over taps
        acc = acc + wd[:, j:j + 1] * hp[:, j * dil:j * dil + t_out]
    y = acc + bd_ref[...]

    # ---- PReLU #2 ------------------------------------------------------------
    a2 = alphas_ref[1]
    y = jnp.where(y >= 0.0, y, a2 * y)

    # ---- GroupNorm #2 (single pass, folded affine) ---------------------------
    n2 = y.size
    s2 = jnp.sum(y)
    q2 = jnp.sum(y * y)
    mean2 = s2 / n2
    var2 = jnp.maximum(q2 / n2 - mean2 * mean2, 0.0)
    inv2 = jax.lax.rsqrt(var2 + eps)
    scale2 = g2_ref[...] * inv2
    shift2 = be2_ref[...] - mean2 * scale2
    y = y * scale2 + shift2

    # ---- fused residual + skip 1x1 projection (one MXU matmul) ---------------
    wrs = wrs_ref[...]
    rs = jnp.dot(wrs, y.astype(wrs.dtype), preferred_element_type=jnp.float32)
    rs = rs + brs_ref[...]
    res_ref[0] = rs[:c_in]
    skip_ref[0] = rs[c_in:]


def depth_conv1d_block(x, params, *, kernel_size, dilation, padding,
                       eps=1e-8, use_bf16_matmul=False):
    """One DepthConv1d_Q block (non-causal, skip=True).

    x: (B, C_in, T) f32.  Returns (residual, skip), each (B, C_in, T_out).
    """
    B, C_in, T = x.shape
    (w1, b1, a1, g1, be1, wd, bd, a2, g2, be2, wr, br, ws, bs) = params
    H = w1.shape[0]
    t_out = T + 2 * padding - dilation * (kernel_size - 1)
    assert t_out > 0

    mm_dtype = jnp.bfloat16 if use_bf16_matmul else jnp.float32
    alphas = jnp.stack([jnp.asarray(a1, jnp.float32), jnp.asarray(a2, jnp.float32)])
    col = lambda v: jnp.asarray(v, jnp.float32).reshape(-1, 1)

    # Fuse res_out / skip_out weights & biases into single operands (trace time).
    w_rs = jnp.concatenate([jnp.asarray(wr, jnp.float32),
                            jnp.asarray(ws, jnp.float32)], axis=0).astype(mm_dtype)
    b_rs = jnp.concatenate([col(br), col(bs)], axis=0)

    kern = functools.partial(_depthconv1d_kernel, k=kernel_size, dil=dilation,
                             pad=padding, t_in=T, t_out=t_out, c_in=C_in, eps=eps)

    def full(shape):
        return pl.BlockSpec(shape, lambda b: (0,) * len(shape))

    res, skip = pl.pallas_call(
        kern,
        grid=(B,),
        in_specs=[
            pl.BlockSpec(memory_space=pltpu.MemorySpace.SMEM),    # PReLU alphas
            pl.BlockSpec((1, C_in, T), lambda b: (b, 0, 0)),      # x
            full((H, C_in)), full((H, 1)),                        # conv1d W, b
            full((H, 1)), full((H, 1)),                           # reg1 gamma, beta
            full((H, kernel_size)), full((H, 1)),                 # dconv1d W, b
            full((H, 1)), full((H, 1)),                           # reg2 gamma, beta
            full((2 * C_in, H)), full((2 * C_in, 1)),             # fused res+skip W, b
        ],
        out_specs=[
            pl.BlockSpec((1, C_in, t_out), lambda b: (b, 0, 0)),
            pl.BlockSpec((1, C_in, t_out), lambda b: (b, 0, 0)),
        ],
        out_shape=[
            jax.ShapeDtypeStruct((B, C_in, t_out), jnp.float32),
            jax.ShapeDtypeStruct((B, C_in, t_out), jnp.float32),
        ],
        scratch_shapes=[pltpu.VMEM((H, T + 2 * padding), jnp.float32)],
        compiler_params=pltpu.CompilerParams(dimension_semantics=("parallel",)),
    )(alphas, jnp.asarray(x, jnp.float32),
      jnp.asarray(w1, jnp.float32).astype(mm_dtype), col(b1), col(g1), col(be1),
      jnp.asarray(wd, jnp.float32), col(bd), col(g2), col(be2),
      w_rs, b_rs)
    return res, skip


def tcn_q_forward(x, layers, *, kernel_size=3, eps=1e-8, use_bf16_matmul=False):
    """TCN_Q.forward (skip=True, non-causal, QA_flag=False, LN unused in forward).

    layers: list of dicts {"params": <14-tuple>, "dilation": d, "padding": p}.
    Returns (output, skip_connection) where output is the residual-updated
    input after the last block.
    # TODO(synk): the original TCN_Q.forward returns `output`, which is never
    # assigned on the skip=True path (a bug in the reference code); we return
    # both the residual-accumulated input and the accumulated skip connection.
    """
    skip_connection = jnp.zeros_like(x)
    for lp in layers:
        res, skp = depth_conv1d_block(
            x, lp["params"], kernel_size=kernel_size,
            dilation=lp["dilation"], padding=lp["padding"],
            eps=eps, use_bf16_matmul=use_bf16_matmul)
        assert res.shape == x.shape          # padding == dilation, kernel=3 -> T_out == T
        x = x + res
        skip_connection = skip_connection + skp
    return x, skip_connection


# ----------------------------- plain-JAX reference ---------------------------

def _block_reference(x, params, kernel_size, dilation, padding, eps=1e-8):
    (w1, b1, a1, g1, be1, wd, bd, a2, g2, be2, wr, br, ws, bs) = params
    h = jnp.einsum('hc,bct->bht', w1, x) + b1[None, :, None]
    h = jnp.where(h >= 0, h, a1 * h)
    m = h.mean(axis=(1, 2), keepdims=True)
    v = ((h - m) ** 2).mean(axis=(1, 2), keepdims=True)
    h = (h - m) / jnp.sqrt(v + eps) * g1[None, :, None] + be1[None, :, None]

    hp = jnp.pad(h, ((0, 0), (0, 0), (padding, padding)))
    t_out = x.shape[2] + 2 * padding - dilation * (kernel_size - 1)
    y = jnp.zeros((x.shape[0], w1.shape[0], t_out), jnp.float32)
    for j in range(kernel_size):
        y = y + wd[None, :, j:j + 1] * hp[:, :, j * dilation:j * dilation + t_out]
    y = y + bd[None, :, None]
    y = jnp.where(y >= 0, y, a2 * y)
    m2 = y.mean(axis=(1, 2), keepdims=True)
    v2 = ((y - m2) ** 2).mean(axis=(1, 2), keepdims=True)
    y = (y - m2) / jnp.sqrt(v2 + eps) * g2[None, :, None] + be2[None, :, None]

    res = jnp.einsum('ch,bht->bct', wr, y) + br[None, :, None]
    skp = jnp.einsum('ch,bht->bct', ws, y) + bs[None, :, None]
    return res, skp


def tcn_reference(x, layers, kernel_size=3, eps=1e-8):
    skip_connection = jnp.zeros_like(x)
    for lp in layers:
        res, skp = _block_reference(x, lp["params"], kernel_size,
                                    lp["dilation"], lp["padding"], eps)
        x = x + res
        skip_connection = skip_connection + skp
    return x, skip_connection


# ------------------------------------ demo -----------------------------------

if __name__ == "__main__":
    # Small but lane-dense shapes: T is a multiple of 128 so matmul N dims and
    # output stores are unmasked (per perf review).
    B, C_in, H, T = 2, 8, 32, 128          # batch, input_dim, hidden_dim, time
    K = 3
    LAYER, STACK = 2, 2                    # dilations 1, 2, 1, 2

    key = jax.random.PRNGKey(0)
    key, xk = jax.random.split(key)
    x = jax.random.normal(xk, (B, C_in, T), jnp.float32)

    def make_block_params(k_):
        ks = jax.random.split(k_, 12)
        w1 = 0.3 * jax.random.normal(ks[0], (H, C_in), jnp.float32)
        b1 = 0.1 * jax.random.normal(ks[1], (H,), jnp.float32)
        a1 = jnp.float32(0.25)                                        # PReLU default
        g1 = 1.0 + 0.1 * jax.random.normal(ks[2], (H,), jnp.float32)
        be1 = 0.1 * jax.random.normal(ks[3], (H,), jnp.float32)
        wd = 0.3 * jax.random.normal(ks[4], (H, K), jnp.float32)
        bd = 0.1 * jax.random.normal(ks[5], (H,), jnp.float32)
        a2 = jnp.float32(0.25)
        g2 = 1.0 + 0.1 * jax.random.normal(ks[6], (H,), jnp.float32)
        be2 = 0.1 * jax.random.normal(ks[7], (H,), jnp.float32)
        wr = 0.3 * jax.random.normal(ks[8], (C_in, H), jnp.float32)
        br = 0.1 * jax.random.normal(ks[9], (C_in,), jnp.float32)
        ws = 0.3 * jax.random.normal(ks[10], (C_in, H), jnp.float32)
        bs = 0.1 * jax.random.normal(ks[11], (C_in,), jnp.float32)
        return (w1, b1, a1, g1, be1, wd, bd, a2, g2, be2, wr, br, ws, bs)

    layers = []
    for s in range(STACK):
        for i in range(LAYER):
            key, sub = jax.random.split(key)
            layers.append({"params": make_block_params(sub),
                           "dilation": 2 ** i, "padding": 2 ** i})

    # f32 MXU path — tight check against the plain-JAX reference.
    out, skp = tcn_q_forward(x, layers, kernel_size=K)
    jax.block_until_ready((out, skp))
    out_ref, skp_ref = tcn_reference(x, layers, kernel_size=K)
    assert jnp.allclose(out, out_ref, atol=1e-3, rtol=1e-3), \
        float(jnp.abs(out - out_ref).max())
    assert jnp.allclose(skp, skp_ref, atol=1e-3, rtol=1e-3), \
        float(jnp.abs(skp - skp_ref).max())

    # bf16-operand MXU path (v6e/v7x perf option) — loose sanity bound vs f32 ref.
    out_bf, skp_bf = tcn_q_forward(x, layers, kernel_size=K, use_bf16_matmul=True)
    jax.block_until_ready((out_bf, skp_bf))
    assert float(jnp.abs(out_bf - out_ref).max()) < 0.3
    assert float(jnp.abs(skp_bf - skp_ref).max()) < 0.3

    print("KERNEL_OK")
</pallas_src>

<mosaic_0001>
module attributes {stable_mosaic.version = 11 : i64} {
  func.func @_depthconv1d_kernel(%arg0: i32, %arg1: memref<2xf32, #tpu.memory_space<smem>>, %arg2: memref<1x8x128xf32, #tpu.memory_space<vmem>>, %arg3: memref<32x8xf32, #tpu.memory_space<vmem>>, %arg4: memref<32x1xf32, #tpu.memory_space<vmem>>, %arg5: memref<32x1xf32, #tpu.memory_space<vmem>>, %arg6: memref<32x1xf32, #tpu.memory_space<vmem>>, %arg7: memref<32x3xf32, #tpu.memory_space<vmem>>, %arg8: memref<32x1xf32, #tpu.memory_space<vmem>>, %arg9: memref<32x1xf32, #tpu.memory_space<vmem>>, %arg10: memref<32x1xf32, #tpu.memory_space<vmem>>, %arg11: memref<16x32xf32, #tpu.memory_space<vmem>>, %arg12: memref<16x1xf32, #tpu.memory_space<vmem>>, %arg13: memref<1x8x128xf32, #tpu.memory_space<vmem>>, %arg14: memref<1x8x128xf32, #tpu.memory_space<vmem>>, %arg15: memref<32x130xf32, #tpu.memory_space<vmem>>) attributes {dimension_semantics = [#tpu.dimension_semantics<parallel>], iteration_bounds = array<i64: 2>, scalar_prefetch = 0 : i64, scratch_operands = 1 : i64, tpu.core_type = #tpu.core_type<tc>, window_params = [{transform_indices = @transform_0, window_bounds = array<i64: 2>}, {transform_indices = @transform_1, window_bounds = array<i64: 1, 8, 128>}, {pipeline_mode = #tpu.pipeline_mode<synchronous>, transform_indices = @transform_2, window_bounds = array<i64: 32, 8>}, {pipeline_mode = #tpu.pipeline_mode<synchronous>, transform_indices = @transform_3, window_bounds = array<i64: 32, 1>}, {pipeline_mode = #tpu.pipeline_mode<synchronous>, transform_indices = @transform_4, window_bounds = array<i64: 32, 1>}, {pipeline_mode = #tpu.pipeline_mode<synchronous>, transform_indices = @transform_5, window_bounds = array<i64: 32, 1>}, {pipeline_mode = #tpu.pipeline_mode<synchronous>, transform_indices = @transform_6, window_bounds = array<i64: 32, 3>}, {pipeline_mode = #tpu.pipeline_mode<synchronous>, transform_indices = @transform_7, window_bounds = array<i64: 32, 1>}, {pipeline_mode = #tpu.pipeline_mode<synchronous>, transform_indices = @transform_8, window_bounds = array<i64: 32, 1>}, {pipeline_mode = #tpu.pipeline_mode<synchronous>, transform_indices = @transform_9, window_bounds = array<i64: 32, 1>}, {pipeline_mode = #tpu.pipeline_mode<synchronous>, transform_indices = @transform_10, window_bounds = array<i64: 16, 32>}, {pipeline_mode = #tpu.pipeline_mode<synchronous>, transform_indices = @transform_11, window_bounds = array<i64: 16, 1>}, {transform_indices = @transform_12, window_bounds = array<i64: 1, 8, 128>}, {transform_indices = @transform_13, window_bounds = array<i64: 1, 8, 128>}]} {
    %c0 = arith.constant 0 : index
    %c0_0 = arith.constant 0 : index
    %c0_1 = arith.constant 0 : index
    %0 = vector.load %arg2[%c0, %c0_0, %c0_1] : memref<1x8x128xf32, #tpu.memory_space<vmem>>, vector<1x8x128xf32>
    %1 = vector.shape_cast %0 : vector<1x8x128xf32> to vector<8x128xf32>
    %c0_2 = arith.constant 0 : index
    %c0_3 = arith.constant 0 : index
    %2 = vector.load %arg3[%c0_2, %c0_3] : memref<32x8xf32, #tpu.memory_space<vmem>>, vector<32x8xf32>
    %cst = arith.constant dense<0.000000e+00> : vector<32x128xf32>
    %3 = tpu.matmul %2, %1, %cst {dimension_numbers = #tpu.dot_dimension_numbers<[1], [0], [0], [1], [0, 0, 1, 1], [], []>} : vector<32x8xf32>, vector<8x128xf32>, vector<32x128xf32> -> vector<32x128xf32>
    %c0_4 = arith.constant 0 : index
    %c0_5 = arith.constant 0 : index
    %4 = vector.load %arg4[%c0_4, %c0_5] : memref<32x1xf32, #tpu.memory_space<vmem>>, vector<32x1xf32>
    %5 = vector.broadcast %4 : vector<32x1xf32> to vector<32x128xf32>
    %6 = arith.addf %3, %5 : vector<32x128xf32>
    %c0_6 = arith.constant 0 : index
    %7 = memref.load %arg1[%c0_6] : memref<2xf32, #tpu.memory_space<smem>>
    %cst_7 = arith.constant 0.000000e+00 : f32
    %8 = vector.broadcast %cst_7 : f32 to vector<32x128xf32>
    %9 = arith.cmpf oge, %6, %8 : vector<32x128xf32>
    %10 = vector.broadcast %7 : f32 to vector<32x128xf32>
    %11 = arith.mulf %10, %6 : vector<32x128xf32>
    %12 = arith.select %9, %6, %11 : vector<32x128xi1>, vector<32x128xf32>
    %13 = vector.shape_cast %12 : vector<32x128xf32> to vector<1x32x128xf32>
    %cst_8 = arith.constant dense<0.000000e+00> : vector<1xf32>
    %14 = vector.multi_reduction <add>, %13, %cst_8 [1, 2] : vector<1x32x128xf32> to vector<1xf32>
    %15 = vector.shape_cast %14 : vector<1xf32> to vector<1x1x1xf32>
    %16 = vector.extract %15[0, 0, 0] : f32 from vector<1x1x1xf32>
    %17 = arith.mulf %12, %12 : vector<32x128xf32>
    %18 = vector.shape_cast %17 : vector<32x128xf32> to vector<1x32x128xf32>
    %cst_9 = arith.constant dense<0.000000e+00> : vector<1xf32>
    %19 = vector.multi_reduction <add>, %18, %cst_9 [1, 2] : vector<1x32x128xf32> to vector<1xf32>
    %20 = vector.shape_cast %19 : vector<1xf32> to vector<1x1x1xf32>
    %21 = vector.extract %20[0, 0, 0] : f32 from vector<1x1x1xf32>
    %cst_10 = arith.constant 4.096000e+03 : f32
    %22 = arith.divf %16, %cst_10 : f32
    %cst_11 = arith.constant 4.096000e+03 : f32
    %23 = arith.divf %21, %cst_11 : f32
    %24 = arith.mulf %22, %22 : f32
    %25 = arith.subf %23, %24 : f32
    %cst_12 = arith.constant 0.000000e+00 : f32
    %26 = arith.maximumf %25, %cst_12 : f32
    %cst_13 = arith.constant 9.99999993E-9 : f32
    %27 = arith.addf %26, %cst_13 : f32
    %28 = math.rsqrt %27 : f32
    %c0_14 = arith.constant 0 : index
    %c0_15 = arith.constant 0 : index
    %29 = vector.load %arg5[%c0_14, %c0_15] : memref<32x1xf32, #tpu.memory_space<vmem>>, vector<32x1xf32>
    %30 = vector.broadcast %28 : f32 to vector<32x1xf32>
    %31 = arith.mulf %29, %30 : vector<32x1xf32>
    %c0_16 = arith.constant 0 : index
    %c0_17 = arith.constant 0 : index
    %32 = vector.load %arg6[%c0_16, %c0_17] : memref<32x1xf32, #tpu.memory_space<vmem>>, vector<32x1xf32>
    %33 = vector.broadcast %22 : f32 to vector<32x1xf32>
    %34 = arith.mulf %33, %31 : vector<32x1xf32>
    %35 = arith.subf %32, %34 : vector<32x1xf32>
    %36 = vector.broadcast %31 : vector<32x1xf32> to vector<32x128xf32>
    %37 = arith.mulf %12, %36 : vector<32x128xf32>
    %38 = vector.broadcast %35 : vector<32x1xf32> to vector<32x128xf32>
    %39 = arith.addf %37, %38 : vector<32x128xf32>
    %cst_18 = arith.constant 0.000000e+00 : f32
    %40 = vector.broadcast %cst_18 : f32 to vector<32x1xf32>
    %c0_19 = arith.constant 0 : index
    %c0_20 = arith.constant 0 : index
    %41 = vector.load %arg15[%c0_19, %c0_20] : memref<32x130xf32, #tpu.memory_space<vmem>>, vector<32x1xf32>
    tpu.vector_store %arg15[%c0_19, %c0_20], %40 {strides = array<i32>} : memref<32x130xf32, #tpu.memory_space<vmem>>, vector<32x1xf32>,
    %cst_21 = arith.constant 0.000000e+00 : f32
    %42 = vector.broadcast %cst_21 : f32 to vector<32x1xf32>
    %c0_22 = arith.constant 0 : index
    %c129 = arith.constant 129 : index
    %43 = vector.load %arg15[%c0_22, %c129] : memref<32x130xf32, #tpu.memory_space<vmem>>, vector<32x1xf32>
    tpu.vector_store %arg15[%c0_22, %c129], %42 {strides = array<i32>} : memref<32x130xf32, #tpu.memory_space<vmem>>, vector<32x1xf32>,
    %c0_23 = arith.constant 0 : index
    %c1 = arith.constant 1 : index
    %44 = vector.load %arg15[%c0_23, %c1] : memref<32x130xf32, #tpu.memory_space<vmem>>, vector<32x128xf32>
    tpu.vector_store %arg15[%c0_23, %c1], %39 {strides = array<i32>} : memref<32x130xf32, #tpu.memory_space<vmem>>, vector<32x128xf32>,
    %c0_24 = arith.constant 0 : index
    %c0_25 = arith.constant 0 : index
    %45 = vector.load %arg15[%c0_24, %c0_25] : memref<32x130xf32, #tpu.memory_space<vmem>>, vector<32x130xf32>
    %c0_26 = arith.constant 0 : index
    %c0_27 = arith.constant 0 : index
    %46 = vector.load %arg7[%c0_26, %c0_27] : memref<32x3xf32, #tpu.memory_space<vmem>>, vector<32x3xf32>
    %cst_28 = arith.constant 0.000000e+00 : f32
    %47 = vector.broadcast %cst_28 : f32 to vector<32x128xf32>
    %48 = vector.extract_strided_slice %46 {offsets = [0, 0], sizes = [32, 1], strides = [1, 1]} : vector<32x3xf32> to vector<32x1xf32>
    %49 = vector.extract_strided_slice %45 {offsets = [0, 0], sizes = [32, 128], strides = [1, 1]} : vector<32x130xf32> to vector<32x128xf32>
    %50 = vector.broadcast %48 : vector<32x1xf32> to vector<32x128xf32>
    %51 = arith.mulf %50, %49 : vector<32x128xf32>
    %52 = arith.addf %47, %51 : vector<32x128xf32>
    %53 = vector.extract_strided_slice %46 {offsets = [0, 1], sizes = [32, 1], strides = [1, 1]} : vector<32x3xf32> to vector<32x1xf32>
    %54 = vector.extract_strided_slice %45 {offsets = [0, 1], sizes = [32, 128], strides = [1, 1]} : vector<32x130xf32> to vector<32x128xf32>
    %55 = vector.broadcast %53 : vector<32x1xf32> to vector<32x128xf32>
    %56 = arith.mulf %55, %54 : vector<32x128xf32>
    %57 = arith.addf %52, %56 : vector<32x128xf32>
    %58 = vector.extract_strided_slice %46 {offsets = [0, 2], sizes = [32, 1], strides = [1, 1]} : vector<32x3xf32> to vector<32x1xf32>
    %59 = vector.extract_strided_slice %45 {offsets = [0, 2], sizes = [32, 128], strides = [1, 1]} : vector<32x130xf32> to vector<32x128xf32>
    %60 = vector.broadcast %58 : vector<32x1xf32> to vector<32x128xf32>
    %61 = arith.mulf %60, %59 : vector<32x128xf32>
    %62 = arith.addf %57, %61 : vector<32x128xf32>
    %c0_29 = arith.constant 0 : index
    %c0_30 = arith.constant 0 : index
    %63 = vector.load %arg8[%c0_29, %c0_30] : memref<32x1xf32, #tpu.memory_space<vmem>>, vector<32x1xf32>
    %64 = vector.broadcast %63 : vector<32x1xf32> to vector<32x128xf32>
    %65 = arith.addf %62, %64 : vector<32x128xf32>
    %c1_31 = arith.constant 1 : index
    %66 = memref.load %arg1[%c1_31] : memref<2xf32, #tpu.memory_space<smem>>
    %cst_32 = arith.constant 0.000000e+00 : f32
    %67 = vector.broadcast %cst_32 : f32 to vector<32x128xf32>
    %68 = arith.cmpf oge, %65, %67 : vector<32x128xf32>
    %69 = vector.broadcast %66 : f32 to vector<32x128xf32>
    %70 = arith.mulf %69, %65 : vector<32x128xf32>
    %71 = arith.select %68, %65, %70 : vector<32x128xi1>, vector<32x128xf32>
    %72 = vector.shape_cast %71 : vector<32x128xf32> to vector<1x32x128xf32>
    %cst_33 = arith.constant dense<0.000000e+00> : vector<1xf32>
    %73 = vector.multi_reduction <add>, %72, %cst_33 [1, 2] : vector<1x32x128xf32> to vector<1xf32>
    %74 = vector.shape_cast %73 : vector<1xf32> to vector<1x1x1xf32>
    %75 = vector.extract %74[0, 0, 0] : f32 from vector<1x1x1xf32>
    %76 = arith.mulf %71, %71 : vector<32x128xf32>
    %77 = vector.shape_cast %76 : vector<32x128xf32> to vector<1x32x128xf32>
    %cst_34 = arith.constant dense<0.000000e+00> : vector<1xf32>
    %78 = vector.multi_reduction <add>, %77, %cst_34 [1, 2] : vector<1x32x128xf32> to vector<1xf32>
    %79 = vector.shape_cast %78 : vector<1xf32> to vector<1x1x1xf32>
    %80 = vector.extract %79[0, 0, 0] : f32 from vector<1x1x1xf32>
    %cst_35 = arith.constant 4.096000e+03 : f32
    %81 = arith.divf %75, %cst_35 : f32
    %cst_36 = arith.constant 4.096000e+03 : f32
    %82 = arith.divf %80, %cst_36 : f32
    %83 = arith.mulf %81, %81 : f32
    %84 = arith.subf %82, %83 : f32
    %cst_37 = arith.constant 0.000000e+00 : f32
    %85 = arith.maximumf %84, %cst_37 : f32
    %cst_38 = arith.constant 9.99999993E-9 : f32
    %86 = arith.addf %85, %cst_38 : f32
    %87 = math.rsqrt %86 : f32
    %c0_39 = arith.constant 0 : index
    %c0_40 = arith.constant 0 : index
    %88 = vector.load %arg9[%c0_39, %c0_40] : memref<32x1xf32, #tpu.memory_space<vmem>>, vector<32x1xf32>
    %89 = vector.broadcast %87 : f32 to vector<32x1xf32>
    %90 = arith.mulf %88, %89 : vector<32x1xf32>
    %c0_41 = arith.constant 0 : index
    %c0_42 = arith.constant 0 : index
    %91 = vector.load %arg10[%c0_41, %c0_42] : memref<32x1xf32, #tpu.memory_space<vmem>>, vector<32x1xf32>
    %92 = vector.broadcast %81 : f32 to vector<32x1xf32>
    %93 = arith.mulf %92, %90 : vector<32x1xf32>
    %94 = arith.subf %91, %93 : vector<32x1xf32>
    %95 = vector.broadcast %90 : vector<32x1xf32> to vector<32x128xf32>
    %96 = arith.mulf %71, %95 : vector<32x128xf32>
    %97 = vector.broadcast %94 : vector<32x1xf32> to vector<32x128xf32>
    %98 = arith.addf %96, %97 : vector<32x128xf32>
    %c0_43 = arith.constant 0 : index
    %c0_44 = arith.constant 0 : index
    %99 = vector.load %arg11[%c0_43, %c0_44] : memref<16x32xf32, #tpu.memory_space<vmem>>, vector<16x32xf32>
    %cst_45 = arith.constant dense<0.000000e+00> : vector<16x128xf32>
    %100 = tpu.matmul %99, %98, %cst_45 {dimension_numbers = #tpu.dot_dimension_numbers<[1], [0], [0], [1], [0, 0, 1, 1], [], []>} : vector<16x32xf32>, vector<32x128xf32>, vector<16x128xf32> -> vector<16x128xf32>
    %c0_46 = arith.constant 0 : index
    %c0_47 = arith.constant 0 : index
    %101 = vector.load %arg12[%c0_46, %c0_47] : memref<16x1xf32, #tpu.memory_space<vmem>>, vector<16x1xf32>
    %102 = vector.broadcast %101 : vector<16x1xf32> to vector<16x128xf32>
    %103 = arith.addf %100, %102 : vector<16x128xf32>
    %104 = vector.extract_strided_slice %103 {offsets = [0, 0], sizes = [8, 128], strides = [1, 1]} : vector<16x128xf32> to vector<8x128xf32>
    %c0_48 = arith.constant 0 : index
    %c0_49 = arith.constant 0 : index
    %c0_50 = arith.constant 0 : index
    %105 = vector.load %arg13[%c0_48, %c0_49, %c0_50] : memref<1x8x128xf32, #tpu.memory_space<vmem>>, vector<1x8x128xf32>
    %106 = vector.shape_cast %105 : vector<1x8x128xf32> to vector<8x128xf32>
    %107 = vector.shape_cast %104 : vector<8x128xf32> to vector<1x8x128xf32>
    tpu.vector_store %arg13[%c0_48, %c0_49, %c0_50], %107 {strides = array<i32>} : memref<1x8x128xf32, #tpu.memory_space<vmem>>, vector<1x8x128xf32>,
    %108 = vector.extract_strided_slice %103 {offsets = [8, 0], sizes = [8, 128], strides = [1, 1]} : vector<16x128xf32> to vector<8x128xf32>
    %c0_51 = arith.constant 0 : index
    %c0_52 = arith.constant 0 : index
    %c0_53 = arith.constant 0 : index
    %109 = vector.load %arg14[%c0_51, %c0_52, %c0_53] : memref<1x8x128xf32, #tpu.memory_space<vmem>>, vector<1x8x128xf32>
    %110 = vector.shape_cast %109 : vector<1x8x128xf32> to vector<8x128xf32>
    %111 = vector.shape_cast %108 : vector<8x128xf32> to vector<1x8x128xf32>
    tpu.vector_store %arg14[%c0_51, %c0_52, %c0_53], %111 {strides = array<i32>} : memref<1x8x128xf32, #tpu.memory_space<vmem>>, vector<1x8x128xf32>,
    return
  }
  func.func @transform_0(%arg0: i32) -> i32 {
    %c0_i32 = arith.constant 0 : i32
    %c0_i32_0 = arith.constant 0 : i32
    return %c0_i32 : i32
  }
  func.func @transform_1(%arg0: i32) -> (i32, i32, i32) {
    %c0_i32 = arith.constant 0 : i32
    %c0_i32_0 = arith.constant 0 : i32
    %c0_i32_1 = arith.constant 0 : i32
    return %arg0, %c0_i32, %c0_i32_0 : i32, i32, i32
  }
  func.func @transform_2(%arg0: i32) -> (i32, i32) {
    %c0_i32 = arith.constant 0 : i32
    %c0_i32_0 = arith.constant 0 : i32
    %c0_i32_1 = arith.constant 0 : i32
    return %c0_i32, %c0_i32_0 : i32, i32
  }
  func.func @transform_3(%arg0: i32) -> (i32, i32) {
    %c0_i32 = arith.constant 0 : i32
    %c0_i32_0 = arith.constant 0 : i32
    %c0_i32_1 = arith.constant 0 : i32
    return %c0_i32, %c0_i32_0 : i32, i32
  }
  func.func @transform_4(%arg0: i32) -> (i32, i32) {
    %c0_i32 = arith.constant 0 : i32
    %c0_i32_0 = arith.constant 0 : i32
    %c0_i32_1 = arith.constant 0 : i32
    return %c0_i32, %c0_i32_0 : i32, i32
  }
  func.func @transform_5(%arg0: i32) -> (i32, i32) {
    %c0_i32 = arith.constant 0 : i32
    %c0_i32_0 = arith.constant 0 : i32
    %c0_i32_1 = arith.constant 0 : i32
    return %c0_i32, %c0_i32_0 : i32, i32
  }
  func.func @transform_6(%arg0: i32) -> (i32, i32) {
    %c0_i32 = arith.constant 0 : i32
    %c0_i32_0 = arith.constant 0 : i32
    %c0_i32_1 = arith.constant 0 : i32
    return %c0_i32, %c0_i32_0 : i32, i32
  }
  func.func @transform_7(%arg0: i32) -> (i32, i32) {
    %c0_i32 = arith.constant 0 : i32
    %c0_i32_0 = arith.constant 0 : i32
    %c0_i32_1 = arith.constant 0 : i32
    return %c0_i32, %c0_i32_0 : i32, i32
  }
  func.func @transform_8(%arg0: i32) -> (i32, i32) {
    %c0_i32 = arith.constant 0 : i32
    %c0_i32_0 = arith.constant 0 : i32
    %c0_i32_1 = arith.constant 0 : i32
    return %c0_i32, %c0_i32_0 : i32, i32
  }
  func.func @transform_9(%arg0: i32) -> (i32, i32) {
    %c0_i32 = arith.constant 0 : i32
    %c0_i32_0 = arith.constant 0 : i32
    %c0_i32_1 = arith.constant 0 : i32
    return %c0_i32, %c0_i32_0 : i32, i32
  }
  func.func @transform_10(%arg0: i32) -> (i32, i32) {
    %c0_i32 = arith.constant 0 : i32
    %c0_i32_0 = arith.constant 0 : i32
    %c0_i32_1 = arith.constant 0 : i32
    return %c0_i32, %c0_i32_0 : i32, i32
  }
  func.func @transform_11(%arg0: i32) -> (i32, i32) {
    %c0_i32 = arith.constant 0 : i32
    %c0_i32_0 = arith.constant 0 : i32
    %c0_i32_1 = arith.constant 0 : i32
    return %c0_i32, %c0_i32_0 : i32, i32
  }
  func.func @transform_12(%arg0: i32) -> (i32, i32, i32) {
    %c0_i32 = arith.constant 0 : i32
    %c0_i32_0 = arith.constant 0 : i32
    %c0_i32_1 = arith.constant 0 : i32
    return %arg0, %c0_i32, %c0_i32_0 : i32, i32, i32
  }
  func.func @transform_13(%arg0: i32) -> (i32, i32, i32) {
    %c0_i32 = arith.constant 0 : i32
    %c0_i32_0 = arith.constant 0 : i32
    %c0_i32_1 = arith.constant 0 : i32
    return %arg0, %c0_i32, %c0_i32_0 : i32, i32, i32
  }
}

</mosaic_0001>

<bundles_post_ra>
// kernel: tpu_custom_call.1
= control target key start
LH: loop header
LB: loop body
LE: loop exit
PB: predicated region body
PF: predicated region fallthrough
CT: control target
= control target key end

     0   :  { %s1874_s0 = inlined_call_operand.vmem [shape: f32[2], index: 0, kind: input, shape index: {}]   ;;  %s1875_s1 = inlined_call_operand.vmem [shape: f32[2,8,128], index: 1, kind: input, shape index: {}]   ;;  %s1876_s2 = inlined_call_operand.vmem [shape: f32[32,8], index: 2, kind: input, shape index: {}]   ;;  %s1877_s3 = inlined_call_operand.vmem [shape: f32[32,1], index: 3, kind: input, shape index: {}]   ;;  %s1878_s4 = inlined_call_operand.vmem [shape: f32[32,1], index: 4, kind: input, shape index: {}]   ;;  %s1879_s5 = inlined_call_operand.vmem [shape: f32[32,1], index: 5, kind: input, shape index: {}]   ;;  %s1880_s6 = inlined_call_operand.vmem [shape: f32[32,3], index: 6, kind: input, shape index: {}]   ;;  %s1881_s7 = inlined_call_operand.vmem [shape: f32[32,1], index: 7, kind: input, shape index: {}]   ;;  %s1882_s8 = inlined_call_operand.vmem [shape: f32[32,1], index: 8, kind: input, shape index: {}]   ;;  %s1883_s9 = inlined_call_operand.vmem [shape: f32[32,1], index: 9, kind: input, shape index: {}]   ;;  %s1884_s10 = inlined_call_operand.vmem [shape: f32[16,32], index: 10, kind: input, shape index: {}]   ;;  %s1885_s11 = inlined_call_operand.vmem [shape: f32[16,1], index: 11, kind: input, shape index: {}]   ;;  %s1886_s12 = inlined_call_operand.hbm [shape: f32[2,8,128], index: 12, kind: output, shape index: {0}]   ;;  %s1887_s13 = inlined_call_operand.hbm [shape: f32[2,8,128], index: 13, kind: output, shape index: {1}]  }
   0x1   :  { %1891 = sst [smem:[#allocation15_spill]] %s1874_s0 }
   0x2   :  { %1892 = sst [smem:[#allocation16_spill]] %s1875_s1 }
   0x3   :  { %1893 = sst [smem:[#allocation17_spill]] %s1876_s2 }
   0x4   :  { %1894 = sst [smem:[#allocation18_spill]] %s1877_s3 }
   0x5   :  { %1895 = sst [smem:[#allocation19_spill]] %s1878_s4 }
   0x6   :  { %19 = vsyncpa [#allocation5], 0 }
   0x7   :  { %20 = vsyncpa [#allocation4], 0 }
   0x8   :  { %22 = vsyncpa [#allocation4 + $0x1], 0 }
   0x9   :  { %23 = vsyncpa [#allocation8], 0 }
   0xa   :  { %25 = vsyncpa [#allocation8 + $0x1], 0  ;;  %s1553_s25 = smov 0   ;;  %s1555_s26 = smov 0  }
   0xb   :  { %s1557_s27 = smov 0   ;;  %s1559_s28 = smov 0  }
   0xc LB: > { %1896 = sst [smem:[#allocation12_spill]] %s1467_s27  ;;  %s1574_s29 = sadd.s32 4294967295, %s1471_s28   ;;  %s1471_s28 = sphi %s1559_s28, %s1906_s28   ;;  %s1467_s27 = sphi %s1557_s27, %s1908_s27   ;;  %s1463_s26 = sphi %s1555_s26, %s1910_s26   ;;  %s1459_s25 = sphi %s1553_s25, %s1909_s25  }
   0xd   : > { %s1234_s30 = sadd.s32 4294967294, %s1471_s28   ;;  %s1578_s14 = sadd.s32 1, %s1471_s28  }
   0xe   : > { %1897 = sst [smem:[#allocation13_spill]] %s1578_s14  ;;  %s295_s15 = sadd.s32 1, %s1467_s27 }
   0xf   : > { %s292_s16 = ssub.s32 %s1471_s28, %s1578_s14  ;;  %p305_p0 = scmp.ne.s32.totalorder %s1467_s27, %s1463_s26 }
  0x10   : > { %p293_p1 = scmp.eq.s32.totalorder %s292_s16, 0  ;;  %p306_p2 = scmp.eq.s32.totalorder %s1574_s29, 1 }
  0x11   : > { %p311_p3 = scmp.ne.s32.totalorder %s1463_s26, %s1459_s25  ;;  %p312_p4 = scmp.eq.s32.totalorder %s1234_s30, 1 }
  0x12   : > { %s1589_s17 = scalar_select %p293_p1, %s1467_s27, %s295_s15  }
  0x13   : > { %p1591_p5 = por %p306_p2, %p305_p0  ;;  %p1595_p6 = por %p312_p4, %p311_p3 }
  0x14   : > { %1898 = sst [smem:[#allocation14_spill]] %s1589_s17  ;;  %p1235_p7 = scmp.ge.s32.totalorder %s1471_s28, 1 }
  0x15   : > { %p345_p8 = scmp.lt.s32.totalorder %s1471_s28, 3  ;;  %p1294_p9 = scmp.eq.s32.totalorder %s1574_s29, 0 }
  0x16   : > { %s1901_s0 = sld [smem:[#allocation15_spill]]  ;;  %s1473_s23 = smov [#allocation3]  }
  0x17   : > { %p346_p10 = pnand %p1235_p7, %p345_p8 }
  0x19   : > { %p1283_p11 = pneg %p346_p10  ;;  %407 = sbr.rel (%p346_p10) target bundleno = 1441 (0x5a1), region = 68 }
  0x1b   : > { %p1284_p12 = pnand %p1294_p9, %p1283_p11 }
  0x1c   : > { %s357_s22 = sshll.u32 %s1901_s0, 4  ;;  %s358_s22 = int_to_ptr.vmem [resolvable:$true] %s357_s22 }
  0x1d   : > { %1286 = dma.vmem_to_smem (!%p1284_p12), %s358_s22, 16, %s1473_s23, [#allocation5]  }
  0x1e   : > { %1446 = dma.done.wait (%p1294_p9), [#allocation5], 16  }
  0x1f   : > { %1448 = vsyncadd (%p1294_p9), [#allocation5], 4294967280 }
  0x20   : > { %414 = sfence }
  0x21   : > { %p457_p13 = scmp.lt.s32.totalorder %s1574_s29, 1  ;;  %s1902_s3 = sld [smem:[#allocation18_spill]]  ;;  %v1474_v1 = vmov 0   ;;  %vm490_vm0 = vcmask 64512   ;;  %v1475_v41 = vmov 4096.0   ;;  %vm678_vm9 = vcmask 7168  }
  0x22   : > { %1339 = vset.pattern.permute.xlu0 %v1474_v1  ;;  %1340 = vset.pattern.permute.xlu1 %v1474_v1  ;;  %s1903_s1 = sld [smem:[#allocation16_spill]]  ;;  %1352 = vrcp.f32 %v1475_v41  ;;  %s1476_s0 = smov 0.0   ;;  %vm683_vm10 = vcmask 15368   ;;  %vm704_vm11 = vcmask 1047560   ;;  %vm801_vm12 = vcmask 1039360  }
  0x23   : > { %s458_s20 = scalar_select %p457_p13, %s1574_s29, 1  ;;  %1341 = vset.pattern.permute.xlu2 %v1474_v1  ;;  %vm862_vm13 = vcmask 1031168  }
  0x24   : > { %s1904_s2 = sld [smem:[#allocation17_spill]] }
  0x25   : > { %s1242_s21 = sshll.u32 %s458_s20, 3  ;;  %s532_s22 = sld [smem:[#allocation3]] }
  0x26   : > { %s1905_s4 = sld [smem:[#allocation19_spill]] }
  0x27   : > { %v466_v0 = vld [vmem:[%s1902_s3] sm:$0xff]  ;;  %v468_v2 = vld [vmem:[%s1902_s3 + $0x10] sm:$0xff]  ;;  %v467_v6 = vld [vmem:[%s1902_s3 + $0x8] sm:$0xff] }
  0x28   : > { %472 = vperm.xlu0 %1339, %v466_v0   ;;  %482 = vperm.xlu1 %1340, %v468_v2   ;;  %s460_s24 = scalar_lea.vmem %s1903_s1, %s1242_s21  ;;  %v469_v7 = vld [vmem:[%s1902_s3 + $0x18] sm:$0xff]  ;;  %v1353_v42 = vpop.eup %1352 }
  0x29   : > { %v461_v5 = vld [vmem:[%s460_s24] sm:$0xff]  ;;  %v575_v46 = vmul.f32 4096.0, %v1353_v42  ;;  %vm579_vm5 = vweird.f32 %v1353_v42 }
  0x2a   : > { %v462_v3 = vld [vmem:[%s1904_s2] sm:$0xff]  ;;  %v464_v4 = vld [vmem:[%s1904_s2 + $0x10] sm:$0xff]  ;;  %518 = vmatpush.msra.mxu0 %v461_v5  ;;  %1256 = vmatpush.msra.mxu2 %v461_v5  ;;  %v463_v8 = vld [vmem:[%s1904_s2 + $0x8] sm:$0xff] }
  0x2b   : > { %1243 = vmatmul.msk.f32.vlgmr.msra.gmra.mxu0 %vm490_vm0, %v462_v3  ;;  %1245 = vmatmul.msk.f32.vlgmr.msra.gmra.mxu2 %vm490_vm0, %v464_v4  ;;  %v465_v9 = vld [vmem:[%s1904_s2 + $0x18] sm:$0xff]  ;;  %v537_v14 = vstv %s532_s22  ;;  %v576_v49 = vsub.f32 1.0, %v575_v46  ;;  %s1481_s22 = smov 127  }
  0x2d   : > { %v577_v55 = vmul.f32 %v1353_v42, %v576_v49 }
  0x2f   : > { %v578_v58 = vadd.f32 %v1353_v42, %v577_v55 }
  0x30   : > { %477 = vperm.xlu0 %1339, %v467_v6   ;;  %487 = vperm.xlu1 %1340, %v469_v7   ;;  %v610_v7 = vld [vmem:[%s1905_s4 + $0x10] sm:$0xff] }
  0x31   : > { %v580_v61 = vsel %vm579_vm5, %v1353_v42, %v578_v58  ;;  %vm1063_vm5 = vcmask 261120  }
  0x33   : > { %1244 = vmatmul.msk.f32.gmra.mxu0 %vm490_vm0, %v463_v8  ;;  %1246 = vmatmul.msk.f32.gmra.mxu2 %vm490_vm0, %v465_v9  ;;  %v609_v8 = vld [vmem:[%s1905_s4 + $0x8] sm:$0xff]  ;;  %v608_v9 = vld [vmem:[%s1905_s4] sm:$0xff] }
  0x9a   : > { %v473_v10 = vpop.permute.xlu0 %472  ;;  %v483_v12 = vpop.permute.xlu1 %482 }
  0xa2   : > { %v478_v16 = vpop.permute.xlu0 %477  ;;  %v488_v25 = vpop.permute.xlu1 %487 }
  0xa8   : > { %v520_v11 = vpop.f32.mrf.mxu0 }
  0xa9   : > { %v521_v13 = vadd.f32 %v520_v11, %v473_v10 }
  0xab   : > { %v538_v18 = vmul.f32 %v537_v14, %v521_v13  ;;  %vm533_vm1 = vcmp.ge.f32.partialorder %v521_v13, 0.0 }
  0xad   : > { %v1637_v22 = vsel %vm533_vm1, %v521_v13, %v538_v18 }
  0xae   : > { %v526_v15 = vpop.f32.mrf.mxu2  ;;  %v558_v34 = vmul.f32 %v1637_v22, %v1637_v22 }
  0xaf   : > { %v527_v19 = vadd.f32 %v526_v15, %v483_v12 }
  0xb0   : > { %v523_v17 = vpop.f32.mrf.mxu0 }
  0xb1   : > { %v524_v20 = vadd.f32 %v523_v17, %v478_v16  ;;  %v540_v23 = vmul.f32 %v537_v14, %v527_v19  ;;  %vm535_vm3 = vcmp.ge.f32.partialorder %v527_v19, 0.0  ;;  %v618_v16 = vld [vmem:[%s1879_s5 + $0x8] sm:$0xff]  ;;  %v611_v17 = vld [vmem:[%s1905_s4 + $0x18] sm:$0xff] }
  0xb3   : > { %vm534_vm2 = vcmp.ge.f32.partialorder %v524_v20, 0.0  ;;  %v539_v21 = vmul.f32 %v537_v14, %v524_v20  ;;  %v1643_v30 = vsel %vm535_vm3, %v527_v19, %v540_v23  ;;  %v721_v19 = vld [vmem:[%s1880_s6] sm:$0xff] }
  0xb4   : > { %v560_v37 = vmul.f32 %v1643_v30, %v1643_v30 }
  0xb5   : > { %v1639_v24 = vsel %vm534_vm2, %v524_v20, %v539_v21  ;;  %v1477_v21 = vmov 1  }
  0xb6   : > { %v529_v26 = vpop.f32.mrf.mxu2  ;;  %v546_v27 = vadd.f32 %v1639_v24, %v1637_v22  ;;  %v559_v31 = vmul.f32 %v1639_v24, %v1639_v24 }
  0xb7   : > { %v530_v28 = vadd.f32 %v529_v26, %v488_v25  ;;  %v619_v25 = vld [vmem:[%s1879_s5 + $0x10] sm:$0xff] }
  0xb8   : > { %v547_v32 = vadd.f32 %v546_v27, %v1643_v30  ;;  %v562_v36 = vadd.f32 %v559_v31, %v558_v34  ;;  %v617_v27 = vld [vmem:[%s1879_s5] sm:$0xff]  ;;  %v723_v34 = vld [vmem:[%s1880_s6 + $0x10] sm:$0xff] }
  0xb9   : > { %v541_v29 = vmul.f32 %v537_v14, %v530_v28  ;;  %vm536_vm4 = vcmp.ge.f32.partialorder %v530_v28, 0.0 }
  0xba   : > { %v563_v39 = vadd.f32 %v562_v36, %v560_v37  ;;  %v722_v36 = vld [vmem:[%s1880_s6 + $0x8] sm:$0xff]  ;;  %v1478_v37 = vmov 2  }
  0xbb   : > { %v1648_v33 = vsel %vm536_vm4, %v530_v28, %v541_v29 }
  0xbc   : > { %v548_v35 = vadd.f32 %v547_v32, %v1648_v33  ;;  %v561_v38 = vmul.f32 %v1648_v33, %v1648_v33  ;;  %v620_v32 = vld [vmem:[%s1879_s5 + $0x18] sm:$0xff] }
  0xbe   : > { %549 = vadd.xlane.f32.xlu2 %v548_v35  ;;  %v564_v40 = vadd.f32 %v563_v39, %v561_v38  ;;  %v724_v38 = vld [vmem:[%s1880_s6 + $0x18] sm:$0xff] }
  0xc6   : > { %565 = vadd.xlane.f32.xlu2 %v564_v40 }
 0x131   : > { %v550_v43 = vpop.xlane.xlu2 %549 }
 0x132   : > { %v551_v44 = vrot.slane %v550_v43, 4 }
 0x134   : > { %v552_v45 = vadd.f32 %v551_v44, %v550_v43 }
 0x136   : > { %v553_v47 = vrot.slane %v552_v45, 2 }
 0x138   : > { %v554_v48 = vadd.f32 %v553_v47, %v552_v45 }
 0x139   : > { %v566_v50 = vpop.xlane.xlu2 %565 }
 0x13a   : > { %v567_v51 = vrot.slane %v566_v50, 4  ;;  %v555_v52 = vrot.slane %v554_v48, 1 }
 0x13c   : > { %v568_v53 = vadd.f32 %v567_v51, %v566_v50  ;;  %v556_v54 = vadd.f32 %v555_v52, %v554_v48 }
 0x13e   : > { %v569_v56 = vrot.slane %v568_v53, 2  ;;  %1261 = vpush %v556_v54 }
 0x140   : > { %v570_v57 = vadd.f32 %v569_v56, %v568_v53 }
 0x142   : > { %v571_v59 = vrot.slane %v570_v57, 1 }
 0x144   : > { %v572_v60 = vadd.f32 %v571_v59, %v570_v57 }
 0x146   : > { %1263 = vpush %v572_v60 }
 0x147   : > { %1265 = vpush %v580_v61 }
 0x16f   : > { %s1262_s14 = spop %1261 }
 0x177   : > { %s1264_s23 = spop %1263 }
 0x178   : > { %s1657_s24 = spop %1265 }
 0x179   : > { %s582_s30 = smul.f32 %s1657_s24, %s1262_s14  ;;  %s1482_s14 = smov 126  }
 0x17a   : > { %s591_s15 = smul.f32 %s1657_s24, %s1264_s23 }
 0x17b   : > { %s592_s16 = smul.f32 %s582_s30, %s582_s30  ;;  %v621_v14 = vstv %s582_s30 }
 0x17d   : > { %s593_s20 = ssub.f32 %s591_s15, %s592_s16  ;;  %s1479_s16 = smov 1  }
 0x17f   : > { %s594_s21 = smax.f32 %s1476_s0, %s593_s20 }
 0x180   : > { %s595_s27 = sadd.f32 1e-08, %s594_s21 }
 0x182   : > { %v596_v62 = vstv %s595_s27 }
 0x183   : > { %1354 = vrsqrt.f32 %v596_v62  ;;  %vm603_vm7 = vweird.f32 %v596_v62 }
 0x189   : > { %v1355_v63 = vpop.eup %1354 }
 0x18a   : > { %v598_v0 = vmul.f32 %v1355_v63, %v596_v62  ;;  %vm604_vm6 = vweird.f32 %v1355_v63 }
 0x18b   : > { %vm605_vm8 = vmor %vm603_vm7, %vm604_vm6 }
 0x18c   : > { %v599_v2 = vmul.f32 %v1355_v63, %v598_v0 }
 0x18e   : > { %v600_v3 = vmul.f32 0.5, %v599_v2 }
 0x190   : > { %v601_v4 = vsub.f32 1.5, %v600_v3 }
 0x192   : > { %v602_v5 = vmul.f32 %v1355_v63, %v601_v4 }
 0x194   : > { %v606_v6 = vsel %vm605_vm8, %v1355_v63, %v602_v5 }
 0x195   : > { %1267 = vpush %v606_v6 }
 0x1c6   : > { %s1268_s20 = spop %1267 }
 0x1c7   : > { %v612_v10 = vstv %s1268_s20  ;;  %s1247_s20 = sld [smem:[#allocation3 + $0x1]] }
 0x1c8   : > { %v615_v11 = vmul.f32 %v612_v10, %v610_v7  ;;  %v614_v12 = vmul.f32 %v612_v10, %v609_v8  ;;  %v613_v13 = vmul.f32 %v612_v10, %v608_v9  ;;  %v616_v20 = vmul.f32 %v612_v10, %v611_v17 }
 0x1ca   : > { %642 = vperm.xlu2 %1341, %v615_v11   ;;  %637 = vperm.xlu1 %1340, %v614_v12   ;;  %v623_v15 = vmul.f32 %v621_v14, %v614_v12  ;;  %v624_v23 = vmul.f32 %v621_v14, %v615_v11  ;;  %v622_v26 = vmul.f32 %v621_v14, %v613_v13 }
 0x1cb   : > { %632 = vperm.xlu0 %1339, %v613_v13   ;;  %v625_v31 = vmul.f32 %v621_v14, %v616_v20 }
 0x1cc   : > { %v627_v18 = vsub.f32 %v618_v16, %v623_v15  ;;  %v628_v28 = vsub.f32 %v619_v25, %v624_v23  ;;  %v626_v29 = vsub.f32 %v617_v27, %v622_v26 }
 0x1cd   : > { %v629_v35 = vsub.f32 %v620_v32, %v625_v31 }
 0x1d2   : > { %661 = vperm.xlu1 %1340, %v627_v18   ;;  %1342 = vset.pattern.permute.xlu2 %v1477_v21 }
 0x1d3   : > { %647 = vperm.xlu0 %1339, %v616_v20   ;;  %754 = vperm.xlu2 %1342, %v721_v19  }
 0x1da   : > { %666 = vperm.xlu1 %1340, %v628_v28  }
 0x1db   : > { %656 = vperm.xlu0 %1339, %v626_v29   ;;  %1345 = vset.pattern.permute.xlu2 %v1478_v37 }
 0x1dc   : > { %815 = vperm.xlu2 %1345, %v721_v19  }
 0x1e2   : > { %1344 = vset.pattern.permute.xlu1 %v1477_v21 }
 0x1e3   : > { %671 = vperm.xlu0 %1339, %v629_v35   ;;  %762 = vperm.xlu1 %1344, %v723_v34   ;;  %v878_v35 = vld [vmem:[%s1881_s7 + $0x18] sm:$0xff] }
 0x1e4   : > { %1347 = vset.pattern.permute.xlu2 %v1477_v21 }
 0x1e5   : > { %766 = vperm.xlu2 %1347, %v724_v38  }
 0x1eb   : > { %1343 = vset.pattern.permute.xlu0 %v1477_v21  ;;  %1346 = vset.pattern.permute.xlu1 %v1478_v37 }
 0x1ec   : > { %819 = vperm.xlu1 %1346, %v722_v36   ;;  %758 = vperm.xlu0 %1343, %v722_v36  }
 0x1ed   : > { %1349 = vset.pattern.permute.xlu2 %v1474_v1 }
 0x1ee   : > { %727 = vperm.xlu2 %1349, %v721_v19  }
 0x1f4   : > { %827 = vperm.xlu1 %1346, %v724_v38   ;;  %1348 = vset.pattern.permute.xlu0 %v1478_v37 }
 0x1f5   : > { %823 = vperm.xlu0 %1348, %v723_v34  }
 0x1fc   : > { %1350 = vset.pattern.permute.xlu1 %v1474_v1 }
 0x1fd   : > { %732 = vperm.xlu1 %1350, %v722_v36   ;;  %1351 = vset.pattern.permute.xlu0 %v1474_v1 }
 0x224   : > { %v643_v45 = vpop.permute.xlu2 %642 }
 0x225   : > { %v652_v46 = vmul.f32 %v643_v45, %v1643_v30  ;;  %v875_v30 = vld [vmem:[%s1881_s7] sm:$0xff] }
 0x23c   : > { %v638_v39 = vpop.permute.xlu1 %637 }
 0x23d   : > { %v633_v40 = vpop.permute.xlu0 %632  ;;  %v651_v41 = vmul.f32 %v638_v39, %v1639_v24  ;;  %v876_v24 = vld [vmem:[%s1881_s7 + $0x8] sm:$0xff] }
 0x23e   : > { %v650_v47 = vmul.f32 %v633_v40, %v1637_v22  ;;  %v1480_v22 = vmov 0.0  }
 0x23f   : > { %680 = vst.msk [vmem:[#allocation2 + $0x10] sm:$0xff] %vm678_vm9, %v1480_v22 }
 0x240   : > { %685 = vst.msk [vmem:[#allocation2 + $0x18] sm:$0xff] %vm683_vm10, %v1480_v22 }
 0x241   : > { %679 = vst.msk [vmem:[#allocation2] sm:$0xff] %vm678_vm9, %v1480_v22 }
 0x242   : > { %681 = vst.msk [vmem:[#allocation2 + $0x20] sm:$0xff] %vm678_vm9, %v1480_v22 }
 0x243   : > { %682 = vst.msk [vmem:[#allocation2 + $0x30] sm:$0xff] %vm678_vm9, %v1480_v22 }
 0x244   : > { %v662_v42 = vpop.permute.xlu1 %661  ;;  %684 = vst.msk [vmem:[#allocation2 + $0x8] sm:$0xff] %vm683_vm10, %v1480_v22 }
 0x245   : > { %v675_v43 = vadd.f32 %v662_v42, %v651_v41  ;;  %v648_v44 = vpop.permute.xlu0 %647  ;;  %686 = vst.msk [vmem:[#allocation2 + $0x28] sm:$0xff] %vm683_vm10, %v1480_v22 }
 0x246   : > { %v653_v1 = vmul.f32 %v648_v44, %v1648_v33  ;;  %687 = vst.msk [vmem:[#allocation2 + $0x38] sm:$0xff] %vm683_vm10, %v1480_v22  ;;  %v755_v33 = vpop.permute.xlu2 %754 }
 0x247   : > { %694 = vrot.lane.b32.xlu2 %v675_v43, %s1479_s16 }
 0x24c   : > { %v667_v48 = vpop.permute.xlu1 %666 }
 0x24d   : > { %v676_v49 = vadd.f32 %v667_v48, %v652_v46  ;;  %v657_v50 = vpop.permute.xlu0 %656 }
 0x24e   : > { %v674_v51 = vadd.f32 %v657_v50, %v650_v47  ;;  %v816_v54 = vpop.permute.xlu2 %815 }
 0x24f   : > { %696 = vrot.lane.b32.xlu0 %v676_v49, %s1479_s16  ;;  %742 = vperm.xlu2 %1349, %v724_v38  }
 0x250   : > { %692 = vrot.lane.b32.xlu1 %v674_v51, %s1479_s16 }
 0x255   : > { %v672_v52 = vpop.permute.xlu0 %671  ;;  %v763_v55 = vpop.permute.xlu1 %762 }
 0x256   : > { %v677_v53 = vadd.f32 %v672_v52, %v653_v1  ;;  %v767_v56 = vpop.permute.xlu2 %766 }
 0x257   : > { %737 = vperm.xlu0 %1351, %v723_v34   ;;  %886 = vperm.xlu2 %1349, %v876_v24   ;;  %v877_v34 = vld [vmem:[%s1881_s7 + $0x10] sm:$0xff] }
 0x258   : > { %698 = vrot.lane.b32.xlu1 %v677_v53, %s1479_s16 }
 0x25e   : > { %v820_v57 = vpop.permute.xlu1 %819  ;;  %v728_v58 = vpop.permute.xlu2 %727 }
 0x25f   : > { %v759_v62 = vpop.permute.xlu0 %758 }
 0x260   : > { %881 = vperm.xlu1 %1350, %v875_v30  }
 0x266   : > { %v828_v59 = vpop.permute.xlu1 %827 }
 0x267   : > { %v824_v3 = vpop.permute.xlu0 %823 }
 0x26f   : > { %v733_v61 = vpop.permute.xlu1 %732 }
 0x2a1   : > { %v695_v60 = vpop.permute.xlu2 %694 }
 0x2a2   : > { %707 = vst.msk [vmem:[#allocation2 + $0x10] sm:$0xff] %vm704_vm11, %v695_v60 }
 0x2a3   : > { %708 = vst.msk [vmem:[#allocation2 + $0x18] sm:$0xff] %vm678_vm9, %v695_v60 }
 0x2a9   : > { %v715_v63 = vld [vmem:[#allocation2 + $0x10] sm:$0xff]  ;;  %v743_v36 = vpop.permute.xlu2 %742 }
 0x2aa   : > { %v1717_v0 = vmul.f32 %v733_v61, %v715_v63  ;;  %v771_v2 = vmul.f32 %v759_v62, %v715_v63  ;;  %v716_v14 = vld [vmem:[#allocation2 + $0x18] sm:$0xff]  ;;  %v832_v17 = vmul.f32 %v820_v57, %v715_v63 }
 0x2ab   : > { %v772_v16 = vmul.f32 %v759_v62, %v716_v14  ;;  %v833_v20 = vmul.f32 %v820_v57, %v716_v14 }
 0x2ac   : > { %789 = vrot.lane.b32.xlu1 %v771_v2, %s1481_s22 }
 0x2b1   : > { %v887_v37 = vpop.permute.xlu2 %886 }
 0x2c1   : > { %v697_v4 = vpop.permute.xlu0 %696 }
 0x2c2   : > { %v693_v5 = vpop.permute.xlu1 %692  ;;  %709 = vst.msk [vmem:[#allocation2 + $0x20] sm:$0xff] %vm704_vm11, %v697_v4 }
 0x2c3   : > { %705 = vst.msk [vmem:[#allocation2] sm:$0xff] %vm704_vm11, %v693_v5 }
 0x2c4   : > { %706 = vst.msk [vmem:[#allocation2 + $0x8] sm:$0xff] %vm678_vm9, %v693_v5  ;;  %v908_v5 = vstv %s1247_s20 }
 0x2c5   : > { %710 = vst.msk [vmem:[#allocation2 + $0x28] sm:$0xff] %vm678_vm9, %v697_v4 }
 0x2c9   : > { %v1724_v6 = vld [vmem:[#allocation2 + $0x20] sm:$0xff]  ;;  %v738_v42 = vpop.permute.xlu0 %737 }
 0x2ca   : > { %v699_v7 = vpop.permute.xlu1 %698  ;;  %v713_v8 = vld [vmem:[#allocation2] sm:$0xff]  ;;  %v773_v9 = vmul.f32 %v763_v55, %v1724_v6  ;;  %v834_v31 = vmul.f32 %v824_v3, %v1724_v6  ;;  %v747_v22 = vmul.f32 %v738_v42, %v1724_v6 }
 0x2cb   : > { %711 = vst.msk [vmem:[#allocation2 + $0x30] sm:$0xff] %vm704_vm11, %v699_v7  ;;  %v714_v10 = vld [vmem:[#allocation2 + $0x8] sm:$0xff]  ;;  %v769_v11 = vmul.f32 %v755_v33, %v713_v8  ;;  %v1728_v12 = vmul.f32 %v728_v58, %v713_v8  ;;  %v830_v15 = vmul.f32 %v816_v54, %v713_v8 }
 0x2cc   : > { %712 = vst.msk [vmem:[#allocation2 + $0x38] sm:$0xff] %vm678_vm9, %v699_v7  ;;  %v770_v13 = vmul.f32 %v755_v33, %v714_v10  ;;  %793 = vrot.lane.b32.xlu1 %v773_v9, %s1481_s22  ;;  %v718_v18 = vld [vmem:[#allocation2 + $0x28] sm:$0xff]  ;;  %v831_v27 = vmul.f32 %v816_v54, %v714_v10 }
 0x2cd   : > { %785 = vrot.lane.b32.xlu2 %v769_v11, %s1481_s22  ;;  %v774_v21 = vmul.f32 %v763_v55, %v718_v18  ;;  %v835_v28 = vmul.f32 %v824_v3, %v718_v18 }
 0x2ce   : > { %787 = vrot.lane.b32.xlu0 %v770_v13, %s1481_s22 }
 0x2d2   : > { %v1735_v19 = vld [vmem:[#allocation2 + $0x30] sm:$0xff]  ;;  %v882_v39 = vpop.permute.xlu1 %881 }
 0x2d3   : > { %v775_v23 = vmul.f32 %v767_v56, %v1735_v19  ;;  %v720_v25 = vld [vmem:[#allocation2 + $0x38] sm:$0xff]  ;;  %v836_v32 = vmul.f32 %v828_v59, %v1735_v19  ;;  %v748_v8 = vmul.f32 %v743_v36, %v1735_v19 }
 0x2d4   : > { %846 = vrot.lane.b32.xlu1 %v830_v15, %s1482_s14  ;;  %v776_v26 = vmul.f32 %v767_v56, %v720_v25  ;;  %v837_v29 = vmul.f32 %v828_v59, %v720_v25 }
 0x2d5   : > { %791 = vrot.lane.b32.xlu2 %v772_v16, %s1481_s22 }
 0x2d6   : > { %850 = vrot.lane.b32.xlu0 %v832_v17, %s1482_s14 }
 0x2dc   : > { %852 = vrot.lane.b32.xlu1 %v833_v20, %s1482_s14 }
 0x2dd   : > { %795 = vrot.lane.b32.xlu2 %v774_v21, %s1481_s22 }
 0x2de   : > { %797 = vrot.lane.b32.xlu0 %v775_v23, %s1481_s22 }
 0x2e4   : > { %799 = vrot.lane.b32.xlu1 %v776_v26, %s1481_s22 }
 0x2e5   : > { %848 = vrot.lane.b32.xlu2 %v831_v27, %s1482_s14 }
 0x2e6   : > { %856 = vrot.lane.b32.xlu0 %v835_v28, %s1482_s14 }
 0x2ec   : > { %860 = vrot.lane.b32.xlu1 %v837_v29, %s1482_s14 }
 0x2ed   : > { %854 = vrot.lane.b32.xlu2 %v834_v31, %s1482_s14 }
 0x2ee   : > { %858 = vrot.lane.b32.xlu0 %v836_v32, %s1482_s14 }
 0x2f5   : > { %891 = vperm.xlu2 %1349, %v877_v34  }
 0x2f6   : > { %896 = vperm.xlu0 %1351, %v878_v35  }
 0x31e   : > { %v790_v40 = vpop.permute.xlu1 %789 }
 0x327   : > { %v786_v38 = vpop.permute.xlu2 %785 }
 0x32f   : > { %v792_v41 = vpop.permute.xlu2 %791 }
 0x330   : > { %v803_v51 = vsel %vm801_vm12, %v790_v40, %v792_v41 }
 0x331   : > { %v811_v30 = vadd.f32 %v803_v51, %v1717_v0 }
 0x337   : > { %v796_v44 = vpop.permute.xlu2 %795 }
 0x33e   : > { %v794_v43 = vpop.permute.xlu1 %793 }
 0x33f   : > { %v849_v48 = vpop.permute.xlu2 %848  ;;  %v804_v24 = vsel %vm801_vm12, %v794_v43, %v796_v44 }
 0x340   : > { %v788_v45 = vpop.permute.xlu0 %787  ;;  %v812_v56 = vadd.f32 %v804_v24, %v747_v22 }
 0x341   : > { %v802_v52 = vsel %vm801_vm12, %v786_v38, %v788_v45 }
 0x342   : > { %v810_v57 = vadd.f32 %v802_v52, %v1728_v12 }
 0x346   : > { %v847_v46 = vpop.permute.xlu1 %846 }
 0x347   : > { %v855_v1 = vpop.permute.xlu2 %854  ;;  %v863_v54 = vsel %vm862_vm13, %v847_v46, %v849_v48 }
 0x348   : > { %v851_v47 = vpop.permute.xlu0 %850  ;;  %v871_v60 = vadd.f32 %v863_v54, %v810_v57  ;;  %v982_v54 = vld [vmem:[%s1882_s8 + $0x18] sm:$0xff] }
 0x34a   : > { %v899_v2 = vadd.f32 %v882_v39, %v871_v60  ;;  %v989_v60 = vld [vmem:[%s1883_s9 + $0x8] sm:$0xff] }
 0x34c   : > { %v909_v9 = vmul.f32 %v908_v5, %v899_v2  ;;  %vm904_vm15 = vcmp.ge.f32.partialorder %v899_v2, 0.0 }
 0x34e   : > { %v853_v49 = vpop.permute.xlu1 %852  ;;  %v1763_v15 = vsel %vm904_vm15, %v899_v2, %v909_v9  ;;  %v988_v9 = vld [vmem:[%s1883_s9] sm:$0xff] }
 0x34f   : > { %v864_v53 = vsel %vm862_vm13, %v851_v47, %v853_v49  ;;  %v892_v63 = vpop.permute.xlu2 %891  ;;  %v929_v21 = vmul.f32 %v1763_v15, %v1763_v15 }
 0x350   : > { %v798_v50 = vpop.permute.xlu0 %797  ;;  %v872_v58 = vadd.f32 %v864_v53, %v811_v30  ;;  %v979_v30 = vld [vmem:[%s1882_s8] sm:$0xff] }
 0x352   : > { %v900_v62 = vadd.f32 %v887_v37, %v872_v58 }
 0x354   : > { %v910_v6 = vmul.f32 %v908_v5, %v900_v62  ;;  %vm905_vm14 = vcmp.ge.f32.partialorder %v900_v62, 0.0 }
 0x356   : > { %v800_v33 = vpop.permute.xlu1 %799  ;;  %v1761_v13 = vsel %vm905_vm14, %v900_v62, %v910_v6  ;;  %v990_v6 = vld [vmem:[%s1883_s9 + $0x10] sm:$0xff] }
 0x357   : > { %v805_v7 = vsel %vm801_vm12, %v798_v50, %v800_v33  ;;  %v930_v18 = vmul.f32 %v1761_v13, %v1761_v13  ;;  %v917_v19 = vadd.f32 %v1761_v13, %v1763_v15  ;;  %v980_v33 = vld [vmem:[%s1882_s8 + $0x8] sm:$0xff] }
 0x358   : > { %v857_v55 = vpop.permute.xlu0 %856  ;;  %v813_v12 = vadd.f32 %v805_v7, %v748_v8 }
 0x359   : > { %v865_v59 = vsel %vm862_vm13, %v855_v1, %v857_v55  ;;  %v933_v27 = vadd.f32 %v930_v18, %v929_v21 }
 0x35a   : > { %v873_v61 = vadd.f32 %v865_v59, %v812_v56 }
 0x35c   : > { %v901_v3 = vadd.f32 %v892_v63, %v873_v61  ;;  %v981_v63 = vld [vmem:[%s1882_s8 + $0x10] sm:$0xff] }
 0x35e   : > { %v861_v0 = vpop.permute.xlu1 %860  ;;  %v911_v10 = vmul.f32 %v908_v5, %v901_v3  ;;  %vm906_vm0 = vcmp.ge.f32.partialorder %v901_v3, 0.0 }
 0x360   : > { %v859_v4 = vpop.permute.xlu0 %858  ;;  %v1765_v16 = vsel %vm906_vm0, %v901_v3, %v911_v10 }
 0x361   : > { %v866_v11 = vsel %vm862_vm13, %v859_v4, %v861_v0  ;;  %v931_v23 = vmul.f32 %v1765_v16, %v1765_v16  ;;  %v918_v26 = vadd.f32 %v917_v19, %v1765_v16  ;;  %v991_v4 = vld [vmem:[%s1883_s9 + $0x18] sm:$0xff] }
 0x362   : > { %v874_v14 = vadd.f32 %v866_v11, %v813_v12  ;;  %v1051_v11 = vld [vmem:[%s1885_s11] sm:$0xff]  ;;  %v1052_v12 = vld [vmem:[%s1885_s11 + $0x8] sm:$0xff] }
 0x363   : > { %v934_v32 = vadd.f32 %v933_v27, %v931_v23 }
 0x368   : > { %v897_v17 = vpop.permute.xlu0 %896 }
 0x369   : > { %v902_v20 = vadd.f32 %v897_v17, %v874_v14 }
 0x36b   : > { %vm907_vm1 = vcmp.ge.f32.partialorder %v902_v20, 0.0  ;;  %v912_v25 = vmul.f32 %v908_v5, %v902_v20 }
 0x36d   : > { %v1776_v28 = vsel %vm907_vm1, %v902_v20, %v912_v25 }
 0x36e   : > { %v919_v29 = vadd.f32 %v918_v26, %v1776_v28  ;;  %v932_v31 = vmul.f32 %v1776_v28, %v1776_v28 }
 0x370   : > { %920 = vadd.xlane.f32.xlu1 %v919_v29  ;;  %v935_v34 = vadd.f32 %v934_v32, %v932_v31 }
 0x372   : > { %936 = vadd.xlane.f32.xlu2 %v935_v34 }
 0x3e3   : > { %v921_v35 = vpop.xlane.xlu1 %920 }
 0x3e4   : > { %v922_v36 = vrot.slane %v921_v35, 4 }
 0x3e5   : > { %v937_v37 = vpop.xlane.xlu2 %936 }
 0x3e6   : > { %v923_v38 = vadd.f32 %v922_v36, %v921_v35  ;;  %v938_v39 = vrot.slane %v937_v37, 4 }
 0x3e8   : > { %v924_v40 = vrot.slane %v923_v38, 2  ;;  %v939_v41 = vadd.f32 %v938_v39, %v937_v37 }
 0x3ea   : > { %v940_v42 = vrot.slane %v939_v41, 2  ;;  %v925_v43 = vadd.f32 %v924_v40, %v923_v38 }
 0x3ec   : > { %v926_v44 = vrot.slane %v925_v43, 1  ;;  %v941_v45 = vadd.f32 %v940_v42, %v939_v41 }
 0x3ee   : > { %v927_v46 = vadd.f32 %v926_v44, %v925_v43  ;;  %v942_v47 = vrot.slane %v941_v45, 1 }
 0x3f0   : > { %1269 = vpush %v927_v46  ;;  %v943_v48 = vadd.f32 %v942_v47, %v941_v45 }
 0x3f2   : > { %1271 = vpush %v943_v48 }
 0x421   : > { %s1270_s21 = spop %1269 }
 0x422   : > { %s953_s27 = smul.f32 %s1270_s21, %s1657_s24 }
 0x423   : > { %s1272_s17 = spop %1271 }
 0x424   : > { %s963_s22 = smul.f32 %s953_s27, %s953_s27  ;;  %v992_v59 = vstv %s953_s27  ;;  %s1825_s27 = sand.u32 1, %s1463_s26  }
 0x425   : > { %s962_s14 = smul.f32 %s1272_s17, %s1657_s24  ;;  %s1252_s24 = sshll.u32 %s1574_s29, 3 }
 0x426   : > { %s1125_s20 = scalar_lea.hbm %s1887_s13, %s1252_s24  ;;  %s1096_s3 = scalar_lea.sflag [#allocation4], %s1825_s27 }
 0x427   : > { %s964_s23 = ssub.f32 %s962_s14, %s963_s22  ;;  %s1129_s2 = sshll.u32 %s1125_s20, 4  ;;  %s1130_s2 = int_to_ptr.hbm [resolvable:$true] %s1129_s2 }
 0x429   : > { %s965_s30 = smax.f32 %s1476_s0, %s964_s23  ;;  %s1240_s0 = sshll.u32 %s1825_s27, 3 }
 0x42a   : > { %s966_s15 = sadd.f32 1e-08, %s965_s30  ;;  %s449_s14 = scalar_lea.vmem [#allocation6], %s1240_s0 }
 0x42b   : > { %s1113_s23 = sshll.u32 %s449_s14, 4  ;;  %s456_s29 = scalar_lea.vmem [#allocation7], %s1240_s0  ;;  %s1114_s23 = int_to_ptr.vmem [resolvable:$true] %s1113_s23 }
 0x42c   : > { %v967_v49 = vstv %s966_s15  ;;  %s1127_s1 = sshll.u32 %s456_s29, 4  ;;  %s1393_s15 = scalar_lea.hbm %s1886_s12, 16  ;;  %s1128_s1 = int_to_ptr.vmem [resolvable:$true] %s1127_s1 }
 0x42d   : > { %1356 = vrsqrt.f32 %v967_v49  ;;  %vm974_vm3 = vweird.f32 %v967_v49 }
 0x433   : > { %v1357_v50 = vpop.eup %1356 }
 0x434   : > { %v969_v51 = vmul.f32 %v1357_v50, %v967_v49  ;;  %vm975_vm2 = vweird.f32 %v1357_v50 }
 0x435   : > { %vm976_vm4 = vmor %vm974_vm3, %vm975_vm2 }
 0x436   : > { %v970_v1 = vmul.f32 %v1357_v50, %v969_v51 }
 0x438   : > { %v971_v24 = vmul.f32 0.5, %v970_v1 }
 0x43a   : > { %v972_v52 = vsub.f32 1.5, %v971_v24 }
 0x43c   : > { %v973_v53 = vmul.f32 %v1357_v50, %v972_v52 }
 0x43e   : > { %v977_v22 = vsel %vm976_vm4, %v1357_v50, %v973_v53 }
 0x43f   : > { %1273 = vpush %v977_v22 }
 0x470   : > { %s1274_s22 = spop %1273 }
 0x471   : > { %v983_v55 = vstv %s1274_s22  ;;  %s1111_s22 = scalar_lea.hbm %s1886_s12, %s1252_s24 }
 0x472   : > { %v984_v56 = vmul.f32 %v983_v55, %v979_v30  ;;  %v985_v57 = vmul.f32 %v983_v55, %v980_v33  ;;  %v987_v58 = vmul.f32 %v983_v55, %v982_v54  ;;  %v986_v2 = vmul.f32 %v983_v55, %v981_v63  ;;  %s1115_s30 = sshll.u32 %s1111_s22, 4  ;;  %s1116_s30 = int_to_ptr.hbm [resolvable:$true] %s1115_s30 }
 0x473   : > { %s1387_s21 = sshra.s32 %s1116_s30, 4  ;;  %s1388_s21 = int_to_ptr.hbm [resolvable:$true] %s1387_s21 }
 0x474   : > { %v994_v61 = vmul.f32 %v992_v59, %v985_v57  ;;  %1018 = vperm.xlu0 %1351, %v987_v58   ;;  %1003 = vperm.xlu2 %1349, %v984_v56   ;;  %v996_v3 = vmul.f32 %v992_v59, %v987_v58  ;;  %v995_v0 = vmul.f32 %v992_v59, %v986_v2  ;;  %s1389_s17 = scalar_lea.hbm %s1388_s21, 8  ;;  %p1394_p3 = scmp.lt.s32.totalorder %s1388_s21, %s1886_s12 }
 0x475   : > { %v993_v8 = vmul.f32 %v992_v59, %v984_v56  ;;  %p1390_p0 = scmp.ne.s32.totalorder %s1388_s21, %s1389_s17  ;;  %p1395_p4 = scmp.lt.s32.totalorder %s1393_s15, %s1389_s17 }
 0x476   : > { %v998_v62 = vsub.f32 %v989_v60, %v994_v61  ;;  %v1000_v5 = vsub.f32 %v991_v4, %v996_v3  ;;  %v999_v7 = vsub.f32 %v990_v6, %v995_v0 }
 0x477   : > { %v997_v10 = vsub.f32 %v988_v9, %v993_v8  ;;  %p1391_p1 = pnand %p1390_p0, %p1591_p5  ;;  %p1396_p7 = por %p1395_p4, %p1394_p3 }
 0x478   : > { %1032 = vperm.xlu1 %1350, %v998_v62  }
 0x479   : > { %p1392_p2 = pneg %p1391_p1 }
 0x47b   : > { %p1397_p8 = pnand %p1396_p7, %p1392_p2 }
 0x47c   : > { %1013 = vperm.xlu0 %1351, %v986_v2  }
 0x484   : > { %1008 = vperm.xlu0 %1351, %v985_v57  }
 0x48c   : > { %1042 = vperm.xlu0 %1351, %v1000_v5  }
 0x494   : > { %1037 = vperm.xlu0 %1351, %v999_v7  }
 0x49c   : > { %1027 = vperm.xlu0 %1351, %v997_v10  }
 0x4a4   : > { %1055 = vperm.xlu0 %1351, %v1051_v11  }
 0x4ac   : > { %1060 = vperm.xlu0 %1351, %v1052_v12  }
 0x4ce   : > { %v1004_v32 = vpop.permute.xlu2 %1003 }
 0x4e6   : > { %v1019_v14 = vpop.permute.xlu0 %1018 }
 0x4e7   : > { %v1024_v20 = vmul.f32 %v1019_v14, %v1776_v28  ;;  %v1021_v28 = vmul.f32 %v1004_v32, %v1763_v15 }
 0x4ea   : > { %v1033_v29 = vpop.permute.xlu1 %1032 }
 0x4ee   : > { %v1014_v17 = vpop.permute.xlu0 %1013 }
 0x4ef   : > { %v1023_v23 = vmul.f32 %v1014_v17, %v1765_v16  ;;  %v1049_v16 = vld [vmem:[%s1884_s10] sm:$0xff] }
 0x4f6   : > { %v1009_v18 = vpop.permute.xlu0 %1008 }
 0x4f7   : > { %v1022_v25 = vmul.f32 %v1009_v18, %v1761_v13  ;;  %v1050_v13 = vld [vmem:[%s1884_s10 + $0x8] sm:$0xff] }
 0x4f9   : > { %v1046_v31 = vadd.f32 %v1033_v29, %v1022_v25 }
 0x4fe   : > { %v1043_v19 = vpop.permute.xlu0 %1042 }
 0x4ff   : > { %v1048_v21 = vadd.f32 %v1043_v19, %v1024_v20 }
 0x501   : > { %1082 = vmatpush.msra.mxu1 %v1048_v21  ;;  %1257 = vmatpush.msra.mxu3 %v1048_v21 }
 0x506   : > { %v1038_v26 = vpop.permute.xlu0 %1037 }
 0x507   : > { %v1047_v27 = vadd.f32 %v1038_v26, %v1023_v23 }
 0x509   : > { %1083 = vmatpush.msra.mxu1 %v1047_v27  ;;  %1258 = vmatpush.msra.mxu3 %v1047_v27 }
 0x50b   : > { %1084 = vmatpush.msra.mxu1 %v1046_v31  ;;  %1259 = vmatpush.msra.mxu3 %v1046_v31 }
 0x50e   : > { %v1028_v34 = vpop.permute.xlu0 %1027 }
 0x50f   : > { %v1045_v35 = vadd.f32 %v1028_v34, %v1021_v28 }
 0x511   : > { %1085 = vmatpush.msra.mxu1 %v1045_v35  ;;  %1260 = vmatpush.msra.mxu3 %v1045_v35 }
 0x512   : > { %1248 = vmatmul.msk.f32.vlgmr.msra.gmra.mxu1 %vm1063_vm5, %v1049_v16  ;;  %1249 = vmatmul.msk.f32.vlgmr.msra.gmra.mxu3 %vm1063_vm5, %v1050_v13 }
 0x516   : > { %v1056_v15 = vpop.permute.xlu0 %1055 }
 0x58f   : > { %v1087_v36 = vpop.f32.mrf.mxu1 }
 0x590   : > { %v1088_v37 = vadd.f32 %v1087_v36, %v1056_v15 }
 0x592   : > { %1093 = vst [vmem:[%s449_s14] sm:$0xff] %v1088_v37 }
 0x593   : > { %1400 = shalt.err (!%p1397_p8)
}
 0x594   : > { %1279 = dma.vmem_to_hbm [thread:$0]  (%p1591_p5), %s1114_s23, 128, %s1116_s30, %s1096_s3   ;;  %v1061_v38 = vpop.permute.xlu0 %1060 }
 0x595   : > { %v1090_v39 = vpop.f32.mrf.mxu3  ;;  %s1101_s4 = scalar_lea.sflag [#allocation8], %s1825_s27  ;;  %s1415_s0 = sshra.s32 %s1130_s2, 4  ;;  %s1416_s0 = int_to_ptr.hbm [resolvable:$true] %s1415_s0 }
 0x596   : > { %v1091_v40 = vadd.f32 %v1090_v39, %v1061_v38  ;;  %s1417_s14 = scalar_lea.hbm %s1416_s0, 8  ;;  %s1421_s17 = scalar_lea.hbm %s1887_s13, 16 }
 0x597   : > { %p1418_p9 = scmp.ne.s32.totalorder %s1416_s0, %s1417_s14  ;;  %p1422_p12 = scmp.lt.s32.totalorder %s1416_s0, %s1887_s13 }
 0x598   : > { %1094 = vst [vmem:[%s456_s29] sm:$0xff] %v1091_v40  ;;  %p1423_p13 = scmp.lt.s32.totalorder %s1421_s17, %s1417_s14 }
 0x599   : > { %p1419_p10 = pnand %p1418_p9, %p1591_p5 }
 0x59a   : > { %p1424_p0 = por %p1423_p13, %p1422_p12 }
 0x59b   : > { %p1420_p11 = pneg %p1419_p10 }
 0x59d   : > { %p1425_p1 = pnand %p1424_p0, %p1420_p11 }
 0x59f   : > { %1428 = shalt.err (!%p1425_p1)
}
 0x5a0   : > { %1280 = dma.vmem_to_hbm [thread:$0]  (%p1591_p5), %s1128_s1, 128, %s1130_s2, %s1101_s4  }
 0x5a1 PF: > { %p1296_p2 = scmp.ge.s32.totalorder %s1471_s28, 2  ;;  %s1141_s27 = sand.u32 1, %s1459_s25  }
 0x5a2   : > { %s1142_s23 = scalar_lea.sflag [#allocation4], %s1141_s27 }
 0x5a3   : > { %p1288_p3 = pnand %p1296_p2, %p1595_p6 }
 0x5a5   : > { %p1289_p4 = pneg %p1288_p3 }
 0x5a7   : > { %1450 = dma.done.wait (%p1289_p4), %s1142_s23, 128  }
 0x5a8   : > { %1452 = vsyncadd (%p1289_p4), %s1142_s23, 4294967168  ;;  %s1152_s30 = scalar_lea.sflag [#allocation8], %s1141_s27 }
 0x5a9   : > { %1454 = dma.done.wait (%p1289_p4), %s1152_s30, 128  }
 0x5aa   : > { %1456 = vsyncadd (%p1289_p4), %s1152_s30, 4294967168  ;;  %s1906_s28 = sld [smem:[#allocation13_spill]]  ;;  %s1909_s25 = smov %s1463_s26 }
 0x5ab   : > { %s1907_s29 = sld [smem:[#allocation12_spill]] }
 0x5ac   : > { %s1908_s27 = sld [smem:[#allocation14_spill]] }
 0x5b0   : > { %p28_p5 = scmp.ge.s32.totalorder %s1906_s28, 4  }
 0x5b1   : > { %s1910_s26 = smov %s1907_s29 }
 0x5b2   :  { %30 = sbr.rel (!%p28_p5) target bundleno = 12 (0xc), region = 125 }
 0x5b7   :  { %1158 = vsyncpa [#allocation4], 1 }
 0x5b8   :  { %1160 = vsyncpa [#allocation4 + $0x1], 1 }
 0x5b9   :  { %1161 = vsyncpa [#allocation8], 1 }
 0x5ba   :  { %1163 = vsyncpa [#allocation8 + $0x1], 1 }
 0x5bb   :  { %1164 = vsyncpa [#allocation5], 1 }
 0x5bc   :  { %1166 = vsyncpa [#allocation5 + $0x1], 1 }

</bundles_post_ra>
